<compile_context>
chip_gen: v6e
topology: v6e:2x2x1
jax: 0.10.0
libtpu: 0.0.40
codegen_flags: <defaults>
</compile_context>

<pallas_src>
import functools

import jax
import jax.numpy as jnp
from jax.experimental import pallas as pl
from jax.experimental.pallas import tpu as pltpu


# ----------------------------------------------------------------------------
# Fused kernel body
# ----------------------------------------------------------------------------
def _fused_convt_kernel(xp_ref, w_ref, bias_ref, o_ref, *, N, IC, OC, KE):
    """Fused convT1->convT2 evaluated as one KExKE full correlation.

    xp_ref:   (IC*N, HP, WP) f32 VMEM  zero-padded input, folded (ic, n)
    w_ref:    (IC*OC*KE*KE,) f32 SMEM  composed effective weights [ic, oc, a, b]
    bias_ref: (OC*N, OH, OW) f32 VMEM  layer-1 bias propagated through layer 2
    o_ref:    (OC*N, OH, OW)      VMEM output, folded (oc, n)
    """
    _, OH, OW = o_ref.shape

    # Seed accumulators with the propagated bias planes (no extra add at the end).
    accs = [bias_ref[oc * N:(oc + 1) * N] for oc in range(OC)]   # each (N, OH, OW) f32

    # z[(oc,n), p, q] = B[oc,p,q]
    #   + sum_{ic,a,b} xp[(ic,n), p+(KE-1-a), q+(KE-1-b)] * W_eff[ic,oc,a,b]
    # Each tap window is a ref-sliced load over all batch planes, reused for
    # every output channel; the per-(tap, ic, oc) weight is a single SMEM scalar
    # splat valid for the whole (N, OH, OW) multiply.
    for a in range(KE):
        hs = KE - 1 - a
        for b in range(KE):
            ws = KE - 1 - b
            for ic in range(IC):
                win = xp_ref[ic * N:(ic + 1) * N, hs:hs + OH, ws:ws + OW]  # (N, OH, OW)
                for oc in range(OC):
                    w = w_ref[((ic * OC + oc) * KE + a) * KE + b]
                    accs[oc] = accs[oc] + win * w

    # Aligned block stores: full trailing extents, whole leading planes.
    for oc in range(OC):
        o_ref[oc * N:(oc + 1) * N] = accs[oc].astype(o_ref.dtype)


# ----------------------------------------------------------------------------
# Wrapper: compose the two transposed convs, then one pallas_call.
# ----------------------------------------------------------------------------
def _compose_weights(w1, w2):
    """Effective kernel of convT(convT(., w1), w2): (IC, OC2, KH1+KH2-1, KW1+KW2-1)."""
    IC, OCm, KH1, KW1 = w1.shape
    _, OC2, KH2, KW2 = w2.shape
    we = jnp.zeros((IC, OC2, KH1 + KH2 - 1, KW1 + KW2 - 1), jnp.float32)
    for kh in range(KH1):
        for kw in range(KW1):
            for ah in range(KH2):
                for aw in range(KW2):
                    we = we.at[:, :, kh + ah, kw + aw].add(
                        jnp.einsum('im,mc->ic', w1[:, :, kh, kw], w2[:, :, ah, aw]))
    return we


def _propagated_bias_plane(b1, w2, oh1, ow1):
    """Layer-1 bias pushed through layer 2 (no bias): (OC2, oh1+KH2-1, ow1+KW2-1)."""
    OCm, OC2, KH2, KW2 = w2.shape
    bp = jnp.zeros((OC2, oh1 + KH2 - 1, ow1 + KW2 - 1), jnp.float32)
    for ah in range(KH2):
        for aw in range(KW2):
            coeff = jnp.einsum('m,mc->c', b1.astype(jnp.float32), w2[:, :, ah, aw])
            bp = bp.at[:, ah:ah + oh1, aw:aw + ow1].add(coeff[:, None, None])
    return bp


def model_forward(x, w1, b1, w2):
    """Forward pass of the PyTorch Model: conv1 (with bias) -> conv2 (no bias).

    x:  (N, IC, H, W) float32
    w1: (IC, OCm, 2, 2), b1: (OCm,), w2: (OCm, OC, 2, 2)  (PyTorch weight layouts)
    """
    N, IC, H, W = x.shape
    _, OCm, KH1, KW1 = w1.shape
    _, OC, KH2, KW2 = w2.shape

    KE = KH1 + KH2 - 1                         # = KW1 + KW2 - 1 (square kernels)
    OH, OW = H + KE - 1, W + KE - 1
    PAD = KE - 1
    HP, WP = H + 2 * PAD, W + 2 * PAD

    if b1 is None:
        b1 = jnp.zeros((OCm,), jnp.float32)

    # One-off composition (outside the hot path; constant-foldable for fixed weights).
    w_eff = _compose_weights(w1, w2)                                       # (IC, OC, KE, KE)
    bias_plane = _propagated_bias_plane(b1, w2, H + KH1 - 1, W + KW1 - 1)  # (OC, OH, OW)
    bias_tiled = jnp.repeat(bias_plane, N, axis=0)                         # (OC*N, OH, OW)

    # Fold (ic, n) onto the leading axis and zero-pad spatially in the wrapper
    # (tiny op, fused by XLA) so the kernel only does ref-sliced loads.
    x_folded = jnp.transpose(x, (1, 0, 2, 3)).reshape(IC * N, H, W).astype(jnp.float32)
    xp = jnp.pad(x_folded, ((0, 0), (PAD, PAD), (PAD, PAD)))               # (IC*N, HP, WP)

    kernel = functools.partial(_fused_convt_kernel, N=N, IC=IC, OC=OC, KE=KE)

    flops = 2 * N * OC * OH * OW * IC * KE * KE
    bytes_accessed = 4 * (xp.size + bias_tiled.size + w_eff.size + N * OC * OH * OW)

    out = pl.pallas_call(
        kernel,
        out_shape=jax.ShapeDtypeStruct((OC * N, OH, OW), x.dtype),
        in_specs=[
            pl.BlockSpec(memory_space=pltpu.MemorySpace.VMEM),     # padded input (folded)
            pl.BlockSpec(memory_space=pltpu.MemorySpace.SMEM),     # composed weights
            pl.BlockSpec(memory_space=pltpu.MemorySpace.VMEM),     # propagated bias planes
        ],
        out_specs=pl.BlockSpec(memory_space=pltpu.MemorySpace.VMEM),
        cost_estimate=pl.CostEstimate(flops=flops, transcendentals=0,
                                      bytes_accessed=bytes_accessed),
    )(xp, w_eff.reshape(-1).astype(jnp.float32), bias_tiled)

    # (OC*N, OH, OW) -> (N, OC, OH, OW)  (tiny wrapper-side transpose, 1.6 KB)
    return out.reshape(OC, N, OH, OW).transpose(1, 0, 2, 3)


# ----------------------------------------------------------------------------
# Pure-JAX reference (scatter formulation of transposed conv) for verification.
# ----------------------------------------------------------------------------
def _convt_ref(x, w, b=None):
    N, IC, H, W = x.shape
    _, OC, KH, KW = w.shape
    OH, OW = H + KH - 1, W + KW - 1
    y = jnp.zeros((N, OC, OH, OW), jnp.float32)
    for kh in range(KH):
        for kw in range(KW):
            contrib = jnp.einsum('nihw,io->nohw', x, w[:, :, kh, kw])
            y = y.at[:, :, kh:kh + H, kw:kw + W].add(contrib)
    if b is not None:
        y = y + b[None, :, None, None]
    return y


if __name__ == "__main__":
    key = jax.random.PRNGKey(0)
    kx, kw1, kb1, kw2 = jax.random.split(key, 4)

    # Small shapes consistent with the module: batch=2, channels=2, spatial=8.
    x = jax.random.normal(kx, (2, 2, 8, 8), jnp.float32)

    # ConvTranspose2d(2, 2, (2, 2)) parameter shapes.
    w1 = jax.random.normal(kw1, (2, 2, 2, 2), jnp.float32) * 0.2
    b1 = jax.random.normal(kb1, (2,), jnp.float32) * 0.2
    w2 = jax.random.normal(kw2, (2, 2, 2, 2), jnp.float32) * 0.2

    y = model_forward(x, w1, b1, w2)
    y = jax.block_until_ready(y)

    # Shape check: (2,2,8,8) -> conv1 -> (2,2,9,9) -> conv2 -> (2,2,10,10)
    assert y.shape == (2, 2, 10, 10), y.shape

    y_ref = _convt_ref(_convt_ref(x, w1, b1), w2, None)
    assert jnp.allclose(y, y_ref, rtol=1e-4, atol=1e-4), (
        float(jnp.max(jnp.abs(y - y_ref))))

    print("KERNEL_OK")
</pallas_src>

<mosaic_0001>
module attributes {stable_mosaic.version = 11 : i64} {
  func.func @_fused_convt_kernel(%arg0: memref<4x12x12xf32, #tpu.memory_space<vmem>>, %arg1: memref<36xf32, #tpu.memory_space<smem>>, %arg2: memref<4x10x10xf32, #tpu.memory_space<vmem>>, %arg3: memref<4x10x10xf32, #tpu.memory_space<vmem>>) attributes {dimension_semantics = [], scalar_prefetch = 0 : i64, scratch_operands = 0 : i64, tpu.core_type = #tpu.core_type<tc>} {
    %c0 = arith.constant 0 : index
    %c0_0 = arith.constant 0 : index
    %c0_1 = arith.constant 0 : index
    %0 = vector.load %arg2[%c0, %c0_0, %c0_1] : memref<4x10x10xf32, #tpu.memory_space<vmem>>, vector<2x10x10xf32>
    %c2 = arith.constant 2 : index
    %c0_2 = arith.constant 0 : index
    %c0_3 = arith.constant 0 : index
    %1 = vector.load %arg2[%c2, %c0_2, %c0_3] : memref<4x10x10xf32, #tpu.memory_space<vmem>>, vector<2x10x10xf32>
    %c0_4 = arith.constant 0 : index
    %c2_5 = arith.constant 2 : index
    %c2_6 = arith.constant 2 : index
    %2 = vector.load %arg0[%c0_4, %c2_5, %c2_6] : memref<4x12x12xf32, #tpu.memory_space<vmem>>, vector<2x10x10xf32>
    %c0_7 = arith.constant 0 : index
    %3 = memref.load %arg1[%c0_7] : memref<36xf32, #tpu.memory_space<smem>>
    %4 = vector.broadcast %3 : f32 to vector<2x10x10xf32>
    %5 = arith.mulf %2, %4 : vector<2x10x10xf32>
    %6 = arith.addf %0, %5 : vector<2x10x10xf32>
    %c9 = arith.constant 9 : index
    %7 = memref.load %arg1[%c9] : memref<36xf32, #tpu.memory_space<smem>>
    %8 = vector.broadcast %7 : f32 to vector<2x10x10xf32>
    %9 = arith.mulf %2, %8 : vector<2x10x10xf32>
    %10 = arith.addf %1, %9 : vector<2x10x10xf32>
    %c2_8 = arith.constant 2 : index
    %c2_9 = arith.constant 2 : index
    %c2_10 = arith.constant 2 : index
    %11 = vector.load %arg0[%c2_8, %c2_9, %c2_10] : memref<4x12x12xf32, #tpu.memory_space<vmem>>, vector<2x10x10xf32>
    %c18 = arith.constant 18 : index
    %12 = memref.load %arg1[%c18] : memref<36xf32, #tpu.memory_space<smem>>
    %13 = vector.broadcast %12 : f32 to vector<2x10x10xf32>
    %14 = arith.mulf %11, %13 : vector<2x10x10xf32>
    %15 = arith.addf %6, %14 : vector<2x10x10xf32>
    %c27 = arith.constant 27 : index
    %16 = memref.load %arg1[%c27] : memref<36xf32, #tpu.memory_space<smem>>
    %17 = vector.broadcast %16 : f32 to vector<2x10x10xf32>
    %18 = arith.mulf %11, %17 : vector<2x10x10xf32>
    %19 = arith.addf %10, %18 : vector<2x10x10xf32>
    %c0_11 = arith.constant 0 : index
    %c2_12 = arith.constant 2 : index
    %c1 = arith.constant 1 : index
    %20 = vector.load %arg0[%c0_11, %c2_12, %c1] : memref<4x12x12xf32, #tpu.memory_space<vmem>>, vector<2x10x10xf32>
    %c1_13 = arith.constant 1 : index
    %21 = memref.load %arg1[%c1_13] : memref<36xf32, #tpu.memory_space<smem>>
    %22 = vector.broadcast %21 : f32 to vector<2x10x10xf32>
    %23 = arith.mulf %20, %22 : vector<2x10x10xf32>
    %24 = arith.addf %15, %23 : vector<2x10x10xf32>
    %c10 = arith.constant 10 : index
    %25 = memref.load %arg1[%c10] : memref<36xf32, #tpu.memory_space<smem>>
    %26 = vector.broadcast %25 : f32 to vector<2x10x10xf32>
    %27 = arith.mulf %20, %26 : vector<2x10x10xf32>
    %28 = arith.addf %19, %27 : vector<2x10x10xf32>
    %c2_14 = arith.constant 2 : index
    %c2_15 = arith.constant 2 : index
    %c1_16 = arith.constant 1 : index
    %29 = vector.load %arg0[%c2_14, %c2_15, %c1_16] : memref<4x12x12xf32, #tpu.memory_space<vmem>>, vector<2x10x10xf32>
    %c19 = arith.constant 19 : index
    %30 = memref.load %arg1[%c19] : memref<36xf32, #tpu.memory_space<smem>>
    %31 = vector.broadcast %30 : f32 to vector<2x10x10xf32>
    %32 = arith.mulf %29, %31 : vector<2x10x10xf32>
    %33 = arith.addf %24, %32 : vector<2x10x10xf32>
    %c28 = arith.constant 28 : index
    %34 = memref.load %arg1[%c28] : memref<36xf32, #tpu.memory_space<smem>>
    %35 = vector.broadcast %34 : f32 to vector<2x10x10xf32>
    %36 = arith.mulf %29, %35 : vector<2x10x10xf32>
    %37 = arith.addf %28, %36 : vector<2x10x10xf32>
    %c0_17 = arith.constant 0 : index
    %c2_18 = arith.constant 2 : index
    %c0_19 = arith.constant 0 : index
    %38 = vector.load %arg0[%c0_17, %c2_18, %c0_19] : memref<4x12x12xf32, #tpu.memory_space<vmem>>, vector<2x10x10xf32>
    %c2_20 = arith.constant 2 : index
    %39 = memref.load %arg1[%c2_20] : memref<36xf32, #tpu.memory_space<smem>>
    %40 = vector.broadcast %39 : f32 to vector<2x10x10xf32>
    %41 = arith.mulf %38, %40 : vector<2x10x10xf32>
    %42 = arith.addf %33, %41 : vector<2x10x10xf32>
    %c11 = arith.constant 11 : index
    %43 = memref.load %arg1[%c11] : memref<36xf32, #tpu.memory_space<smem>>
    %44 = vector.broadcast %43 : f32 to vector<2x10x10xf32>
    %45 = arith.mulf %38, %44 : vector<2x10x10xf32>
    %46 = arith.addf %37, %45 : vector<2x10x10xf32>
    %c2_21 = arith.constant 2 : index
    %c2_22 = arith.constant 2 : index
    %c0_23 = arith.constant 0 : index
    %47 = vector.load %arg0[%c2_21, %c2_22, %c0_23] : memref<4x12x12xf32, #tpu.memory_space<vmem>>, vector<2x10x10xf32>
    %c20 = arith.constant 20 : index
    %48 = memref.load %arg1[%c20] : memref<36xf32, #tpu.memory_space<smem>>
    %49 = vector.broadcast %48 : f32 to vector<2x10x10xf32>
    %50 = arith.mulf %47, %49 : vector<2x10x10xf32>
    %51 = arith.addf %42, %50 : vector<2x10x10xf32>
    %c29 = arith.constant 29 : index
    %52 = memref.load %arg1[%c29] : memref<36xf32, #tpu.memory_space<smem>>
    %53 = vector.broadcast %52 : f32 to vector<2x10x10xf32>
    %54 = arith.mulf %47, %53 : vector<2x10x10xf32>
    %55 = arith.addf %46, %54 : vector<2x10x10xf32>
    %c0_24 = arith.constant 0 : index
    %c1_25 = arith.constant 1 : index
    %c2_26 = arith.constant 2 : index
    %56 = vector.load %arg0[%c0_24, %c1_25, %c2_26] : memref<4x12x12xf32, #tpu.memory_space<vmem>>, vector<2x10x10xf32>
    %c3 = arith.constant 3 : index
    %57 = memref.load %arg1[%c3] : memref<36xf32, #tpu.memory_space<smem>>
    %58 = vector.broadcast %57 : f32 to vector<2x10x10xf32>
    %59 = arith.mulf %56, %58 : vector<2x10x10xf32>
    %60 = arith.addf %51, %59 : vector<2x10x10xf32>
    %c12 = arith.constant 12 : index
    %61 = memref.load %arg1[%c12] : memref<36xf32, #tpu.memory_space<smem>>
    %62 = vector.broadcast %61 : f32 to vector<2x10x10xf32>
    %63 = arith.mulf %56, %62 : vector<2x10x10xf32>
    %64 = arith.addf %55, %63 : vector<2x10x10xf32>
    %c2_27 = arith.constant 2 : index
    %c1_28 = arith.constant 1 : index
    %c2_29 = arith.constant 2 : index
    %65 = vector.load %arg0[%c2_27, %c1_28, %c2_29] : memref<4x12x12xf32, #tpu.memory_space<vmem>>, vector<2x10x10xf32>
    %c21 = arith.constant 21 : index
    %66 = memref.load %arg1[%c21] : memref<36xf32, #tpu.memory_space<smem>>
    %67 = vector.broadcast %66 : f32 to vector<2x10x10xf32>
    %68 = arith.mulf %65, %67 : vector<2x10x10xf32>
    %69 = arith.addf %60, %68 : vector<2x10x10xf32>
    %c30 = arith.constant 30 : index
    %70 = memref.load %arg1[%c30] : memref<36xf32, #tpu.memory_space<smem>>
    %71 = vector.broadcast %70 : f32 to vector<2x10x10xf32>
    %72 = arith.mulf %65, %71 : vector<2x10x10xf32>
    %73 = arith.addf %64, %72 : vector<2x10x10xf32>
    %c0_30 = arith.constant 0 : index
    %c1_31 = arith.constant 1 : index
    %c1_32 = arith.constant 1 : index
    %74 = vector.load %arg0[%c0_30, %c1_31, %c1_32] : memref<4x12x12xf32, #tpu.memory_space<vmem>>, vector<2x10x10xf32>
    %c4 = arith.constant 4 : index
    %75 = memref.load %arg1[%c4] : memref<36xf32, #tpu.memory_space<smem>>
    %76 = vector.broadcast %75 : f32 to vector<2x10x10xf32>
    %77 = arith.mulf %74, %76 : vector<2x10x10xf32>
    %78 = arith.addf %69, %77 : vector<2x10x10xf32>
    %c13 = arith.constant 13 : index
    %79 = memref.load %arg1[%c13] : memref<36xf32, #tpu.memory_space<smem>>
    %80 = vector.broadcast %79 : f32 to vector<2x10x10xf32>
    %81 = arith.mulf %74, %80 : vector<2x10x10xf32>
    %82 = arith.addf %73, %81 : vector<2x10x10xf32>
    %c2_33 = arith.constant 2 : index
    %c1_34 = arith.constant 1 : index
    %c1_35 = arith.constant 1 : index
    %83 = vector.load %arg0[%c2_33, %c1_34, %c1_35] : memref<4x12x12xf32, #tpu.memory_space<vmem>>, vector<2x10x10xf32>
    %c22 = arith.constant 22 : index
    %84 = memref.load %arg1[%c22] : memref<36xf32, #tpu.memory_space<smem>>
    %85 = vector.broadcast %84 : f32 to vector<2x10x10xf32>
    %86 = arith.mulf %83, %85 : vector<2x10x10xf32>
    %87 = arith.addf %78, %86 : vector<2x10x10xf32>
    %c31 = arith.constant 31 : index
    %88 = memref.load %arg1[%c31] : memref<36xf32, #tpu.memory_space<smem>>
    %89 = vector.broadcast %88 : f32 to vector<2x10x10xf32>
    %90 = arith.mulf %83, %89 : vector<2x10x10xf32>
    %91 = arith.addf %82, %90 : vector<2x10x10xf32>
    %c0_36 = arith.constant 0 : index
    %c1_37 = arith.constant 1 : index
    %c0_38 = arith.constant 0 : index
    %92 = vector.load %arg0[%c0_36, %c1_37, %c0_38] : memref<4x12x12xf32, #tpu.memory_space<vmem>>, vector<2x10x10xf32>
    %c5 = arith.constant 5 : index
    %93 = memref.load %arg1[%c5] : memref<36xf32, #tpu.memory_space<smem>>
    %94 = vector.broadcast %93 : f32 to vector<2x10x10xf32>
    %95 = arith.mulf %92, %94 : vector<2x10x10xf32>
    %96 = arith.addf %87, %95 : vector<2x10x10xf32>
    %c14 = arith.constant 14 : index
    %97 = memref.load %arg1[%c14] : memref<36xf32, #tpu.memory_space<smem>>
    %98 = vector.broadcast %97 : f32 to vector<2x10x10xf32>
    %99 = arith.mulf %92, %98 : vector<2x10x10xf32>
    %100 = arith.addf %91, %99 : vector<2x10x10xf32>
    %c2_39 = arith.constant 2 : index
    %c1_40 = arith.constant 1 : index
    %c0_41 = arith.constant 0 : index
    %101 = vector.load %arg0[%c2_39, %c1_40, %c0_41] : memref<4x12x12xf32, #tpu.memory_space<vmem>>, vector<2x10x10xf32>
    %c23 = arith.constant 23 : index
    %102 = memref.load %arg1[%c23] : memref<36xf32, #tpu.memory_space<smem>>
    %103 = vector.broadcast %102 : f32 to vector<2x10x10xf32>
    %104 = arith.mulf %101, %103 : vector<2x10x10xf32>
    %105 = arith.addf %96, %104 : vector<2x10x10xf32>
    %c32 = arith.constant 32 : index
    %106 = memref.load %arg1[%c32] : memref<36xf32, #tpu.memory_space<smem>>
    %107 = vector.broadcast %106 : f32 to vector<2x10x10xf32>
    %108 = arith.mulf %101, %107 : vector<2x10x10xf32>
    %109 = arith.addf %100, %108 : vector<2x10x10xf32>
    %c0_42 = arith.constant 0 : index
    %c0_43 = arith.constant 0 : index
    %c2_44 = arith.constant 2 : index
    %110 = vector.load %arg0[%c0_42, %c0_43, %c2_44] : memref<4x12x12xf32, #tpu.memory_space<vmem>>, vector<2x10x10xf32>
    %c6 = arith.constant 6 : index
    %111 = memref.load %arg1[%c6] : memref<36xf32, #tpu.memory_space<smem>>
    %112 = vector.broadcast %111 : f32 to vector<2x10x10xf32>
    %113 = arith.mulf %110, %112 : vector<2x10x10xf32>
    %114 = arith.addf %105, %113 : vector<2x10x10xf32>
    %c15 = arith.constant 15 : index
    %115 = memref.load %arg1[%c15] : memref<36xf32, #tpu.memory_space<smem>>
    %116 = vector.broadcast %115 : f32 to vector<2x10x10xf32>
    %117 = arith.mulf %110, %116 : vector<2x10x10xf32>
    %118 = arith.addf %109, %117 : vector<2x10x10xf32>
    %c2_45 = arith.constant 2 : index
    %c0_46 = arith.constant 0 : index
    %c2_47 = arith.constant 2 : index
    %119 = vector.load %arg0[%c2_45, %c0_46, %c2_47] : memref<4x12x12xf32, #tpu.memory_space<vmem>>, vector<2x10x10xf32>
    %c24 = arith.constant 24 : index
    %120 = memref.load %arg1[%c24] : memref<36xf32, #tpu.memory_space<smem>>
    %121 = vector.broadcast %120 : f32 to vector<2x10x10xf32>
    %122 = arith.mulf %119, %121 : vector<2x10x10xf32>
    %123 = arith.addf %114, %122 : vector<2x10x10xf32>
    %c33 = arith.constant 33 : index
    %124 = memref.load %arg1[%c33] : memref<36xf32, #tpu.memory_space<smem>>
    %125 = vector.broadcast %124 : f32 to vector<2x10x10xf32>
    %126 = arith.mulf %119, %125 : vector<2x10x10xf32>
    %127 = arith.addf %118, %126 : vector<2x10x10xf32>
    %c0_48 = arith.constant 0 : index
    %c0_49 = arith.constant 0 : index
    %c1_50 = arith.constant 1 : index
    %128 = vector.load %arg0[%c0_48, %c0_49, %c1_50] : memref<4x12x12xf32, #tpu.memory_space<vmem>>, vector<2x10x10xf32>
    %c7 = arith.constant 7 : index
    %129 = memref.load %arg1[%c7] : memref<36xf32, #tpu.memory_space<smem>>
    %130 = vector.broadcast %129 : f32 to vector<2x10x10xf32>
    %131 = arith.mulf %128, %130 : vector<2x10x10xf32>
    %132 = arith.addf %123, %131 : vector<2x10x10xf32>
    %c16 = arith.constant 16 : index
    %133 = memref.load %arg1[%c16] : memref<36xf32, #tpu.memory_space<smem>>
    %134 = vector.broadcast %133 : f32 to vector<2x10x10xf32>
    %135 = arith.mulf %128, %134 : vector<2x10x10xf32>
    %136 = arith.addf %127, %135 : vector<2x10x10xf32>
    %c2_51 = arith.constant 2 : index
    %c0_52 = arith.constant 0 : index
    %c1_53 = arith.constant 1 : index
    %137 = vector.load %arg0[%c2_51, %c0_52, %c1_53] : memref<4x12x12xf32, #tpu.memory_space<vmem>>, vector<2x10x10xf32>
    %c25 = arith.constant 25 : index
    %138 = memref.load %arg1[%c25] : memref<36xf32, #tpu.memory_space<smem>>
    %139 = vector.broadcast %138 : f32 to vector<2x10x10xf32>
    %140 = arith.mulf %137, %139 : vector<2x10x10xf32>
    %141 = arith.addf %132, %140 : vector<2x10x10xf32>
    %c34 = arith.constant 34 : index
    %142 = memref.load %arg1[%c34] : memref<36xf32, #tpu.memory_space<smem>>
    %143 = vector.broadcast %142 : f32 to vector<2x10x10xf32>
    %144 = arith.mulf %137, %143 : vector<2x10x10xf32>
    %145 = arith.addf %136, %144 : vector<2x10x10xf32>
    %c0_54 = arith.constant 0 : index
    %c0_55 = arith.constant 0 : index
    %c0_56 = arith.constant 0 : index
    %146 = vector.load %arg0[%c0_54, %c0_55, %c0_56] : memref<4x12x12xf32, #tpu.memory_space<vmem>>, vector<2x10x10xf32>
    %c8 = arith.constant 8 : index
    %147 = memref.load %arg1[%c8] : memref<36xf32, #tpu.memory_space<smem>>
    %148 = vector.broadcast %147 : f32 to vector<2x10x10xf32>
    %149 = arith.mulf %146, %148 : vector<2x10x10xf32>
    %150 = arith.addf %141, %149 : vector<2x10x10xf32>
    %c17 = arith.constant 17 : index
    %151 = memref.load %arg1[%c17] : memref<36xf32, #tpu.memory_space<smem>>
    %152 = vector.broadcast %151 : f32 to vector<2x10x10xf32>
    %153 = arith.mulf %146, %152 : vector<2x10x10xf32>
    %154 = arith.addf %145, %153 : vector<2x10x10xf32>
    %c2_57 = arith.constant 2 : index
    %c0_58 = arith.constant 0 : index
    %c0_59 = arith.constant 0 : index
    %155 = vector.load %arg0[%c2_57, %c0_58, %c0_59] : memref<4x12x12xf32, #tpu.memory_space<vmem>>, vector<2x10x10xf32>
    %c26 = arith.constant 26 : index
    %156 = memref.load %arg1[%c26] : memref<36xf32, #tpu.memory_space<smem>>
    %157 = vector.broadcast %156 : f32 to vector<2x10x10xf32>
    %158 = arith.mulf %155, %157 : vector<2x10x10xf32>
    %159 = arith.addf %150, %158 : vector<2x10x10xf32>
    %c35 = arith.constant 35 : index
    %160 = memref.load %arg1[%c35] : memref<36xf32, #tpu.memory_space<smem>>
    %161 = vector.broadcast %160 : f32 to vector<2x10x10xf32>
    %162 = arith.mulf %155, %161 : vector<2x10x10xf32>
    %163 = arith.addf %154, %162 : vector<2x10x10xf32>
    %c0_60 = arith.constant 0 : index
    %c0_61 = arith.constant 0 : index
    %c0_62 = arith.constant 0 : index
    %164 = vector.load %arg3[%c0_60, %c0_61, %c0_62] : memref<4x10x10xf32, #tpu.memory_space<vmem>>, vector<2x10x10xf32>
    tpu.vector_store %arg3[%c0_60, %c0_61, %c0_62], %159 {strides = array<i32>} : memref<4x10x10xf32, #tpu.memory_space<vmem>>, vector<2x10x10xf32>,
    %c2_63 = arith.constant 2 : index
    %c0_64 = arith.constant 0 : index
    %c0_65 = arith.constant 0 : index
    %165 = vector.load %arg3[%c2_63, %c0_64, %c0_65] : memref<4x10x10xf32, #tpu.memory_space<vmem>>, vector<2x10x10xf32>
    tpu.vector_store %arg3[%c2_63, %c0_64, %c0_65], %163 {strides = array<i32>} : memref<4x10x10xf32, #tpu.memory_space<vmem>>, vector<2x10x10xf32>,
    return
  }
}

</mosaic_0001>

<bundles_post_ra>
// kernel: tpu_custom_call.1
= control target key start
LH: loop header
LB: loop body
LE: loop exit
PB: predicated region body
PF: predicated region fallthrough
CT: control target
= control target key end

     0   :  { %8 = vsyncpa [#allocation3], 0  ;;  %s1446_s0 = inlined_call_operand.vmem [shape: f32[4,12,12], index: 0, kind: input, shape index: {}]   ;;  %s1447_s1 = inlined_call_operand.vmem [shape: f32[36], index: 1, kind: input, shape index: {}]   ;;  %s1448_s2 = inlined_call_operand.vmem [shape: f32[4,10,10], index: 2, kind: input, shape index: {}]   ;;  %s1449_s3 = inlined_call_operand.vmem [shape: f32[4,10,10], index: 3, kind: output, shape index: {}]  }
   0x1   :  { %s17_s14 = sshll.u32 %s1447_s1, 4  ;;  %s18_s14 = int_to_ptr.vmem [resolvable:$true] %s17_s14 }
   0x2   :  { %s879_s15 = scalar_lea.vmem %s18_s14, 16  ;;  %p884_p1 = scmp.lt.s32.totalorder %s18_s14, %s18_s14 }
   0x3   :  { %p880_p0 = scmp.ne.s32.totalorder %s18_s14, %s879_s15  ;;  %p885_p2 = scmp.lt.s32.totalorder %s879_s15, %s879_s15 }
   0x5   :  { %p886_p3 = por %p885_p2, %p884_p1 }
   0x7   :  { %p887_p4 = pnand %p886_p3, %p880_p0 }
   0x9   :  { %890 = shalt.err (!%p887_p4)
}
   0xa   :  { %s893_s16 = smov [#allocation2]  }
   0xb   :  { %20 = dma.vmem_to_smem %s18_s14, 16, %s893_s16, [#allocation3]  }
   0xc   :  { %891 = dma.done.wait [#allocation3], 16  }
   0xd   :  { %892 = vsyncadd [#allocation3], 4294967280 }
   0xe   :  { %26 = sfence }
   0xf   :  { %s40_s17 = sld [smem:[#allocation2]]  ;;  %v922_v0 = vld [vmem:[%s1446_s0 + $0x12] sm:$0xff]  ;;  %v927_v1 = vld [vmem:[%s1446_s0 + $0x2] sm:$0xff]  ;;  %v932_v3 = vld [vmem:[%s1446_s0 + $0x1a] sm:$0x3]  ;;  %s894_s26 = smov 126  }
  0x10   :  { %s825_s18 = sld [smem:[#allocation2 + $0x9]]  ;;  %v937_v4 = vld [vmem:[%s1446_s0 + $0xa] sm:$0x3]  ;;  %v961_v16 = vld [vmem:[%s1446_s0 + $0x22] sm:$0xff]  ;;  %v970_v19 = vld [vmem:[%s1446_s0 + $0x3a] sm:$0x3] }
  0x11   :  { %s830_s27 = sld [smem:[#allocation2 + $0x12]]  ;;  %v956_v14 = vld [vmem:[%s1446_s0 + $0x2a] sm:$0x3]  ;;  %v975_v20 = vld [vmem:[%s1446_s0 + $0x32] sm:$0xff]  ;;  %s895_s12 = smov 127   ;;  %v1029_v50 = vld [vmem:[%s1446_s0 + $0x1] sm:$0xff] }
  0x12   :  { %s831_s5 = sld [smem:[#allocation2 + $0x1b]]  ;;  %v1024_v48 = vld [vmem:[%s1446_s0 + $0x9] sm:$0x3]  ;;  %v1038_v53 = vld [vmem:[%s1446_s0 + $0x19] sm:$0x3]  ;;  %v1043_v54 = vld [vmem:[%s1446_s0 + $0x11] sm:$0xff] }
  0x13   :  { %s832_s10 = sld [smem:[#allocation2 + $0x1]]  ;;  %v1060_v62 = vld [vmem:[%s1446_s0 + $0x29] sm:$0x3]  ;;  %vm807_vm0 = vcmask 74752   ;;  %vm805_vm1 = vcmask 80896  }
  0x14   :  { %s833_s11 = sld [smem:[#allocation2 + $0xa]] }
  0x15   :  { %v41_v2 = vstv %s40_s17  ;;  %s834_s13 = sld [smem:[#allocation2 + $0x13]] }
  0x16   :  { %v44_v5 = vmul.f32 %v41_v2, %v922_v0  ;;  %v42_v6 = vmul.f32 %v41_v2, %v927_v1  ;;  %v45_v7 = vmul.f32 %v41_v2, %v932_v3  ;;  %v43_v8 = vmul.f32 %v41_v2, %v937_v4  ;;  %s835_s14 = sld [smem:[#allocation2 + $0x1c]]  ;;  %v1065_v2 = vld [vmem:[%s1446_s0 + $0x21] sm:$0xff] }
  0x17   :  { %v67_v9 = vstv %s825_s18  ;;  %v98_v15 = vstv %s830_s27  ;;  %s840_s15 = sld [smem:[#allocation2 + $0x3]] }
  0x18   :  { %54 = vrot.lane.b32.xlu1 %v44_v5, %s894_s26  ;;  %50 = vrot.lane.b32.xlu0 %v42_v6, %s894_s26  ;;  %v69_v10 = vmul.f32 %v67_v9, %v937_v4  ;;  %v68_v11 = vmul.f32 %v67_v9, %v927_v1  ;;  %v71_v12 = vmul.f32 %v67_v9, %v932_v3  ;;  %v124_v23 = vstv %s831_s5  ;;  %s841_s20 = sld [smem:[#allocation2 + $0xc]] }
  0x19   :  { %v70_v13 = vmul.f32 %v67_v9, %v922_v0  ;;  %v100_v17 = vmul.f32 %v956_v14, %v98_v15  ;;  %v99_v18 = vmul.f32 %v961_v16, %v98_v15  ;;  %v102_v21 = vmul.f32 %v970_v19, %v98_v15  ;;  %s846_s24 = sld [smem:[#allocation2 + $0x15]] }
  0x1a   :  { %v101_v22 = vmul.f32 %v975_v20, %v98_v15  ;;  %v126_v24 = vmul.f32 %v956_v14, %v124_v23  ;;  %v125_v25 = vmul.f32 %v961_v16, %v124_v23  ;;  %v128_v26 = vmul.f32 %v970_v19, %v124_v23  ;;  %s847_s30 = sld [smem:[#allocation2 + $0x1e]] }
  0x1b   :  { %v127_v27 = vmul.f32 %v975_v20, %v124_v23  ;;  %v150_v28 = vstv %s832_s10  ;;  %v176_v33 = vstv %s833_s11  ;;  %v202_v38 = vstv %s834_s13  ;;  %s848_s8 = sld [smem:[#allocation2 + $0x4]] }
  0x1c   :  { %56 = vrot.lane.b32.xlu1 %v45_v7, %s894_s26  ;;  %52 = vrot.lane.b32.xlu0 %v43_v8, %s894_s26  ;;  %v152_v29 = vmul.f32 %v150_v28, %v937_v4  ;;  %v151_v30 = vmul.f32 %v150_v28, %v927_v1  ;;  %v154_v31 = vmul.f32 %v150_v28, %v932_v3  ;;  %v228_v43 = vstv %s835_s14  ;;  %v1074_v7 = vld [vmem:[%s1446_s0 + $0x39] sm:$0x3]  ;;  %s849_s9 = sld [smem:[#allocation2 + $0xd]] }
  0x1d   :  { %v153_v32 = vmul.f32 %v150_v28, %v922_v0  ;;  %v178_v34 = vmul.f32 %v176_v33, %v937_v4  ;;  %v177_v35 = vmul.f32 %v176_v33, %v927_v1  ;;  %v180_v36 = vmul.f32 %v176_v33, %v932_v3  ;;  %v1079_v8 = vld [vmem:[%s1446_s0 + $0x31] sm:$0xff]  ;;  %s850_s10 = sld [smem:[#allocation2 + $0x16]] }
  0x1e   :  { %v179_v37 = vmul.f32 %v176_v33, %v922_v0  ;;  %v204_v39 = vmul.f32 %v956_v14, %v202_v38  ;;  %v203_v40 = vmul.f32 %v961_v16, %v202_v38  ;;  %v206_v41 = vmul.f32 %v970_v19, %v202_v38  ;;  %s851_s11 = sld [smem:[#allocation2 + $0x1f]] }
  0x1f   :  { %v205_v42 = vmul.f32 %v975_v20, %v202_v38  ;;  %v230_v44 = vmul.f32 %v956_v14, %v228_v43  ;;  %v229_v45 = vmul.f32 %v961_v16, %v228_v43  ;;  %v232_v46 = vmul.f32 %v970_v19, %v228_v43  ;;  %s856_s13 = sld [smem:[#allocation2 + $0x6]] }
  0x20   :  { %78 = vrot.lane.b32.xlu1 %v69_v10, %s894_s26  ;;  %76 = vrot.lane.b32.xlu0 %v68_v11, %s894_s26  ;;  %v231_v47 = vmul.f32 %v975_v20, %v228_v43  ;;  %v298_v49 = vstv %s840_s15  ;;  %v324_v57 = vstv %s841_s20  ;;  %s857_s18 = sld [smem:[#allocation2 + $0xf]] }
  0x21   :  { %v300_v51 = vmul.f32 %v298_v49, %v1024_v48  ;;  %v299_v52 = vmul.f32 %v298_v49, %v1029_v50  ;;  %v302_v55 = vmul.f32 %v298_v49, %v1038_v53  ;;  %v301_v56 = vmul.f32 %v298_v49, %v1043_v54  ;;  %s862_s27 = sld [smem:[#allocation2 + $0x18]] }
  0x22   :  { %v326_v58 = vmul.f32 %v324_v57, %v1024_v48  ;;  %v325_v59 = vmul.f32 %v324_v57, %v1029_v50  ;;  %v328_v60 = vmul.f32 %v324_v57, %v1038_v53  ;;  %v327_v61 = vmul.f32 %v324_v57, %v1043_v54  ;;  %v27_v57 = vld [vmem:[%s1448_s2] sm:$0xff]  ;;  %s863_s14 = sld [smem:[#allocation2 + $0x21]] }
  0x23   :  { %v354_v63 = vstv %s846_s24  ;;  %v380_v11 = vstv %s847_s30  ;;  %s864_s21 = sld [smem:[#allocation2 + $0x7]] }
  0x24   :  { %82 = vrot.lane.b32.xlu1 %v71_v12, %s894_s26  ;;  %80 = vrot.lane.b32.xlu0 %v70_v13, %s894_s26  ;;  %v356_v5 = vmul.f32 %v1060_v62, %v354_v63  ;;  %v355_v6 = vmul.f32 %v1065_v2, %v354_v63  ;;  %v358_v9 = vmul.f32 %v1074_v7, %v354_v63  ;;  %s838_s22 = sld [smem:[#allocation2 + $0x14]] }
  0x25   :  { %v357_v10 = vmul.f32 %v1079_v8, %v354_v63  ;;  %v382_v12 = vmul.f32 %v1060_v62, %v380_v11  ;;  %v381_v13 = vmul.f32 %v1065_v2, %v380_v11  ;;  %v384_v15 = vmul.f32 %v1074_v7, %v380_v11  ;;  %s865_s23 = sld [smem:[#allocation2 + $0x10]] }
  0x26   :  { %s837_s24 = sld [smem:[#allocation2 + $0xb]] }
  0x27   :  { %s1225_s25 = sld [smem:[#allocation2 + $0x1d]] }
  0x28   :  { %109 = vrot.lane.b32.xlu1 %v100_v17, %s894_s26  ;;  %107 = vrot.lane.b32.xlu0 %v99_v18, %s894_s26  ;;  %v383_v17 = vmul.f32 %v1079_v8, %v380_v11  ;;  %v406_v18 = vstv %s848_s8  ;;  %v30_v11 = vld [vmem:[%s1448_s2 + $0x18] sm:$0x3]  ;;  %s854_s28 = sld [smem:[#allocation2 + $0x17]] }
  0x29   :  { %v410_v23 = vmul.f32 %v406_v18, %v1038_v53  ;;  %s853_s29 = sld [smem:[#allocation2 + $0xe]] }
  0x2a   :  { %s855_s30 = sld [smem:[#allocation2 + $0x20]] }
  0x2b   :  { %s868_s4 = sld [smem:[#allocation2 + $0x8]] }
  0x2c   :  { %113 = vrot.lane.b32.xlu1 %v102_v21, %s894_s26  ;;  %111 = vrot.lane.b32.xlu0 %v101_v22, %s894_s26  ;;  %v408_v21 = vmul.f32 %v406_v18, %v1024_v48  ;;  %v407_v22 = vmul.f32 %v406_v18, %v1029_v50  ;;  %s870_s5 = sld [smem:[#allocation2 + $0x1a]] }
  0x2d   :  { %s1358_s6 = sld [smem:[#allocation2 + $0x11]] }
  0x2e   :  { %s1364_s7 = sld [smem:[#allocation2 + $0x23]] }
  0x30   :  { %135 = vrot.lane.b32.xlu1 %v126_v24, %s894_s26  ;;  %133 = vrot.lane.b32.xlu0 %v125_v25, %s894_s26  ;;  %v409_v24 = vmul.f32 %v406_v18, %v1043_v54  ;;  %v432_v25 = vstv %s849_s9 }
  0x31   :  { %v436_v28 = vmul.f32 %v432_v25, %v1038_v53 }
  0x34   :  { %139 = vrot.lane.b32.xlu1 %v128_v26, %s894_s26  ;;  %137 = vrot.lane.b32.xlu0 %v127_v27, %s894_s26  ;;  %v434_v26 = vmul.f32 %v432_v25, %v1024_v48  ;;  %v433_v27 = vmul.f32 %v432_v25, %v1029_v50 }
  0x38   :  { %161 = vrot.lane.b32.xlu1 %v152_v29, %s895_s12  ;;  %159 = vrot.lane.b32.xlu0 %v151_v30, %s895_s12  ;;  %v435_v29 = vmul.f32 %v432_v25, %v1043_v54  ;;  %v458_v30 = vstv %s850_s10  ;;  %v821_v25 = vld [vmem:[%s1448_s2 + $0x20] sm:$0xff] }
  0x39   :  { %v462_v33 = vmul.f32 %v1074_v7, %v458_v30 }
  0x3c   :  { %165 = vrot.lane.b32.xlu1 %v154_v31, %s895_s12  ;;  %163 = vrot.lane.b32.xlu0 %v153_v32, %s895_s12  ;;  %v460_v31 = vmul.f32 %v1060_v62, %v458_v30  ;;  %v459_v32 = vmul.f32 %v1065_v2, %v458_v30 }
  0x40   :  { %187 = vrot.lane.b32.xlu1 %v178_v34, %s895_s12  ;;  %185 = vrot.lane.b32.xlu0 %v177_v35, %s895_s12  ;;  %v461_v34 = vmul.f32 %v1079_v8, %v458_v30  ;;  %v484_v35 = vstv %s851_s11 }
  0x41   :  { %v486_v38 = vmul.f32 %v1060_v62, %v484_v35  ;;  %v487_v43 = vmul.f32 %v1079_v8, %v484_v35 }
  0x44   :  { %191 = vrot.lane.b32.xlu1 %v180_v36, %s895_s12  ;;  %189 = vrot.lane.b32.xlu0 %v179_v37, %s895_s12 }
  0x48   :  { %213 = vrot.lane.b32.xlu1 %v204_v39, %s895_s12  ;;  %211 = vrot.lane.b32.xlu0 %v203_v40, %s895_s12  ;;  %v485_v39 = vmul.f32 %v1065_v2, %v484_v35 }
  0x4c   :  { %217 = vrot.lane.b32.xlu1 %v206_v41, %s895_s12  ;;  %215 = vrot.lane.b32.xlu0 %v205_v42, %s895_s12  ;;  %v488_v42 = vmul.f32 %v1074_v7, %v484_v35  ;;  %v610_v35 = vstv %s862_s27  ;;  %s1257_s27 = sld [smem:[#allocation2 + $0x22]] }
  0x50   :  { %239 = vrot.lane.b32.xlu1 %v230_v44, %s895_s12  ;;  %237 = vrot.lane.b32.xlu0 %v229_v45, %s895_s12  ;;  %v1128_v44 = vld [vmem:[%s1446_s0 + $0x8] sm:$0x3]  ;;  %v554_v45 = vstv %s856_s13 }
  0x54   :  { %243 = vrot.lane.b32.xlu1 %v232_v46, %s895_s12  ;;  %241 = vrot.lane.b32.xlu0 %v231_v47, %s895_s12  ;;  %v1133_v46 = vld [vmem:[%s1446_s0] sm:$0xff] }
  0x58   :  { %309 = vrot.lane.b32.xlu1 %v300_v51, %s894_s26  ;;  %307 = vrot.lane.b32.xlu0 %v299_v52, %s894_s26  ;;  %v556_v51 = vmul.f32 %v554_v45, %v1128_v44  ;;  %v555_v52 = vmul.f32 %v554_v45, %v1133_v46 }
  0x5c   :  { %313 = vrot.lane.b32.xlu1 %v302_v55, %s894_s26  ;;  %311 = vrot.lane.b32.xlu0 %v301_v56, %s894_s26  ;;  %v1142_v55 = vld [vmem:[%s1446_s0 + $0x18] sm:$0x3]  ;;  %v1147_v56 = vld [vmem:[%s1446_s0 + $0x10] sm:$0xff] }
  0x5d   :  { %v557_v63 = vmul.f32 %v554_v45, %v1147_v56 }
  0x60   :  { %335 = vrot.lane.b32.xlu1 %v326_v58, %s894_s26  ;;  %333 = vrot.lane.b32.xlu0 %v325_v59, %s894_s26  ;;  %v28_v58 = vld [vmem:[%s1448_s2 + $0x8] sm:$0x3] }
  0x64   :  { %339 = vrot.lane.b32.xlu1 %v328_v60, %s894_s26  ;;  %337 = vrot.lane.b32.xlu0 %v327_v61, %s894_s26  ;;  %v558_v61 = vmul.f32 %v554_v45, %v1142_v55 }
  0x68   :  { %365 = vrot.lane.b32.xlu1 %v356_v5, %s894_s26  ;;  %363 = vrot.lane.b32.xlu0 %v355_v6, %s894_s26 }
  0x6c   :  { %369 = vrot.lane.b32.xlu1 %v358_v9, %s894_s26  ;;  %367 = vrot.lane.b32.xlu0 %v357_v10, %s894_s26  ;;  %v580_v9 = vstv %s857_s18  ;;  %v29_v10 = vld [vmem:[%s1448_s2 + $0x10] sm:$0xff] }
  0x6d   :  { %v582_v18 = vmul.f32 %v580_v9, %v1128_v44  ;;  %v584_v30 = vmul.f32 %v580_v9, %v1142_v55 }
  0x70   :  { %391 = vrot.lane.b32.xlu1 %v382_v12, %s894_s26  ;;  %389 = vrot.lane.b32.xlu0 %v381_v13, %s894_s26 }
  0x74   :  { %395 = vrot.lane.b32.xlu1 %v384_v15, %s894_s26  ;;  %393 = vrot.lane.b32.xlu0 %v383_v17, %s894_s26 }
  0x78   :  { %417 = vrot.lane.b32.xlu1 %v408_v21, %s895_s12  ;;  %415 = vrot.lane.b32.xlu0 %v407_v22, %s895_s12  ;;  %v581_v21 = vmul.f32 %v580_v9, %v1133_v46 }
  0x7c   :  { %421 = vrot.lane.b32.xlu1 %v410_v23, %s895_s12  ;;  %419 = vrot.lane.b32.xlu0 %v409_v24, %s895_s12  ;;  %v822_v24 = vld [vmem:[%s1448_s2 + $0x28] sm:$0x3] }
  0x80   :  { %443 = vrot.lane.b32.xlu1 %v434_v26, %s895_s12  ;;  %441 = vrot.lane.b32.xlu0 %v433_v27, %s895_s12 }
  0x84   :  { %447 = vrot.lane.b32.xlu1 %v436_v28, %s895_s12  ;;  %445 = vrot.lane.b32.xlu0 %v435_v29, %s895_s12 }
  0x88   :  { %469 = vrot.lane.b32.xlu1 %v460_v31, %s895_s12  ;;  %467 = vrot.lane.b32.xlu0 %v459_v32, %s895_s12  ;;  %v583_v31 = vmul.f32 %v580_v9, %v1147_v56 }
  0x8a   :  { %v55_v36 = vpop.permute.xlu1 %54  ;;  %v51_v37 = vpop.permute.xlu0 %50 }
  0x8b   :  { %v62_v5 = vadd.f32 %v51_v37, %v27_v57  ;;  %v64_v22 = vadd.f32 %v55_v36, %v29_v10  ;;  %v1187_v36 = vld [vmem:[%s1446_s0 + $0x20] sm:$0xff]  ;;  %v824_v37 = vld [vmem:[%s1448_s2 + $0x38] sm:$0x3] }
  0x8c   :  { %473 = vrot.lane.b32.xlu1 %v462_v33, %s895_s12  ;;  %471 = vrot.lane.b32.xlu0 %v461_v34, %s895_s12  ;;  %v1182_v34 = vld [vmem:[%s1446_s0 + $0x28] sm:$0x3]  ;;  %v611_v45 = vmul.f32 %v1187_v36, %v610_v35 }
  0x8e   :  { %v57_v40 = vpop.permute.xlu1 %56  ;;  %v53_v41 = vpop.permute.xlu0 %52 }
  0x8f   :  { %v63_v6 = vadd.f32 %v53_v41, %v28_v58  ;;  %v65_v23 = vadd.f32 %v57_v40, %v30_v11 }
  0x90   :  { %495 = vrot.lane.b32.xlu1 %v486_v38, %s895_s12  ;;  %493 = vrot.lane.b32.xlu0 %v485_v39, %s895_s12  ;;  %v823_v38 = vld [vmem:[%s1448_s2 + $0x30] sm:$0xff] }
  0x92   :  { %v79_v47 = vpop.permute.xlu1 %78  ;;  %v77_v49 = vpop.permute.xlu0 %76 }
  0x93   :  { %v89_v32 = vadd.f32 %v822_v24, %v79_v47  ;;  %v88_v33 = vadd.f32 %v821_v25, %v77_v49  ;;  %v662_v24 = vstv %s864_s21 }
  0x94   :  { %499 = vrot.lane.b32.xlu1 %v488_v42, %s895_s12  ;;  %497 = vrot.lane.b32.xlu0 %v487_v43, %s895_s12  ;;  %v612_v43 = vmul.f32 %v1182_v34, %v610_v35 }
  0x96   :  { %v83_v59 = vpop.permute.xlu1 %82  ;;  %v81_v60 = vpop.permute.xlu0 %80 }
  0x97   :  { %v91_v47 = vadd.f32 %v824_v37, %v83_v59  ;;  %v90_v49 = vadd.f32 %v823_v38, %v81_v60  ;;  %v666_v38 = vmul.f32 %v662_v24, %v1142_v55 }
  0x98   :  { %565 = vrot.lane.b32.xlu1 %v556_v51, %s894_s26  ;;  %563 = vrot.lane.b32.xlu0 %v555_v52, %s894_s26  ;;  %v1202_v51 = vld [vmem:[%s1446_s0 + $0x38] sm:$0x3]  ;;  %v1207_v52 = vld [vmem:[%s1446_s0 + $0x30] sm:$0xff]  ;;  %s836_s0 = sld [smem:[#allocation2 + $0x2]] }
  0x99   :  { %v614_v59 = vmul.f32 %v1202_v51, %v610_v35  ;;  %v613_v60 = vmul.f32 %v1207_v52, %v610_v35 }
  0x9a   :  { %v110_v12 = vpop.permute.xlu1 %109  ;;  %v108_v13 = vpop.permute.xlu0 %107 }
  0x9b   :  { %v120_v15 = vadd.f32 %v110_v12, %v63_v6  ;;  %v119_v17 = vadd.f32 %v108_v13, %v62_v5  ;;  %v636_v5 = vstv %s863_s14 }
  0x9c   :  { %569 = vrot.lane.b32.xlu1 %v558_v61, %s894_s26  ;;  %567 = vrot.lane.b32.xlu0 %v557_v63, %s894_s26  ;;  %v638_v12 = vmul.f32 %v1182_v34, %v636_v5  ;;  %v637_v13 = vmul.f32 %v1187_v36, %v636_v5 }
  0x9e   :  { %v114_v26 = vpop.permute.xlu1 %113  ;;  %v112_v27 = vpop.permute.xlu0 %111 }
  0x9f   :  { %v122_v28 = vadd.f32 %v114_v26, %v65_v23  ;;  %v121_v29 = vadd.f32 %v112_v27, %v64_v22 }
  0xa0   :  { %591 = vrot.lane.b32.xlu1 %v582_v18, %s894_s26  ;;  %589 = vrot.lane.b32.xlu0 %v581_v21, %s894_s26 }
  0xa2   :  { %v136_v39 = vpop.permute.xlu1 %135  ;;  %v134_v40 = vpop.permute.xlu0 %133 }
  0xa3   :  { %v146_v41 = vadd.f32 %v136_v39, %v89_v32  ;;  %v145_v42 = vadd.f32 %v134_v40, %v88_v33  ;;  %v254_v33 = vstv %s836_s0  ;;  %v665_v39 = vmul.f32 %v662_v24, %v1147_v56 }
  0xa4   :  { %595 = vrot.lane.b32.xlu1 %v584_v30, %s894_s26  ;;  %593 = vrot.lane.b32.xlu0 %v583_v31, %s894_s26  ;;  %v274_v40 = vstv %s838_s22 }
  0xa6   :  { %v140_v57 = vpop.permute.xlu1 %139  ;;  %v138_v58 = vpop.permute.xlu0 %137 }
  0xa7   :  { %v148_v61 = vadd.f32 %v140_v57, %v91_v47  ;;  %v147_v63 = vadd.f32 %v138_v58, %v90_v49  ;;  %v276_v58 = vmul.f32 %v956_v14, %v274_v40 }
  0xa8   :  { %621 = vrot.lane.b32.xlu1 %v612_v43, %s894_s26  ;;  %619 = vrot.lane.b32.xlu0 %v611_v45, %s894_s26  ;;  %v688_v43 = vstv %s865_s23 }
  0xaa   :  { %v162_v6 = vpop.permute.xlu1 %161  ;;  %v160_v9 = vpop.permute.xlu0 %159 }
  0xab   :  { %v172_v10 = vadd.f32 %v162_v6, %v120_v15  ;;  %v171_v11 = vadd.f32 %v160_v9, %v119_v17  ;;  %v640_v15 = vmul.f32 %v1202_v51, %v636_v5  ;;  %v639_v17 = vmul.f32 %v1207_v52, %v636_v5 }
  0xac   :  { %625 = vrot.lane.b32.xlu1 %v614_v59, %s894_s26  ;;  %623 = vrot.lane.b32.xlu0 %v613_v60, %s894_s26  ;;  %v690_v59 = vmul.f32 %v688_v43, %v1128_v44  ;;  %v689_v60 = vmul.f32 %v688_v43, %v1133_v46  ;;  %v257_v9 = vmul.f32 %v254_v33, %v922_v0 }
  0xae   :  { %v166_v18 = vpop.permute.xlu1 %165  ;;  %v164_v21 = vpop.permute.xlu0 %163 }
  0xaf   :  { %v174_v22 = vadd.f32 %v166_v18, %v122_v28  ;;  %v173_v23 = vadd.f32 %v164_v21, %v121_v29  ;;  %v664_v28 = vmul.f32 %v662_v24, %v1128_v44  ;;  %v663_v29 = vmul.f32 %v662_v24, %v1133_v46 }
  0xb0   :  { %647 = vrot.lane.b32.xlu1 %v638_v12, %s894_s26  ;;  %645 = vrot.lane.b32.xlu0 %v637_v13, %s894_s26  ;;  %v278_v13 = vmul.f32 %v970_v19, %v274_v40  ;;  %v277_v18 = vmul.f32 %v975_v20, %v274_v40  ;;  %v284_v21 = vstv %s1225_s25 }
  0xb2   :  { %v188_v25 = vpop.permute.xlu1 %187  ;;  %v186_v26 = vpop.permute.xlu0 %185 }
  0xb3   :  { %v198_v27 = vadd.f32 %v188_v25, %v146_v41  ;;  %v197_v30 = vadd.f32 %v186_v26, %v145_v42  ;;  %v256_v41 = vmul.f32 %v254_v33, %v937_v4  ;;  %v255_v42 = vmul.f32 %v254_v33, %v927_v1 }
  0xb4   :  { %651 = vrot.lane.b32.xlu1 %v640_v15, %s894_s26  ;;  %649 = vrot.lane.b32.xlu0 %v639_v17, %s894_s26  ;;  %s1237_s26 = sld [smem:[#allocation2 + $0x19]] }
  0xb6   :  { %v192_v31 = vpop.permute.xlu1 %191  ;;  %v190_v32 = vpop.permute.xlu0 %189 }
  0xb7   :  { %v1227_v35 = vadd.f32 %v192_v31, %v148_v61  ;;  %v1229_v37 = vadd.f32 %v190_v32, %v147_v63  ;;  %v275_v61 = vmul.f32 %v961_v16, %v274_v40  ;;  %v258_v63 = vmul.f32 %v254_v33, %v932_v3 }
  0xb8   :  { %673 = vrot.lane.b32.xlu1 %v664_v28, %s895_s12  ;;  %671 = vrot.lane.b32.xlu0 %v663_v29, %s895_s12  ;;  %v692_v28 = vmul.f32 %v688_v43, %v1142_v55  ;;  %v691_v29 = vmul.f32 %v688_v43, %v1147_v56  ;;  %v285_v40 = vmul.f32 %v961_v16, %v284_v21 }
  0xba   :  { %v214_v45 = vpop.permute.xlu1 %213  ;;  %v212_v47 = vpop.permute.xlu0 %211 }
  0xbb   :  { %v224_v49 = vadd.f32 %v214_v45, %v172_v10  ;;  %v223_v57 = vadd.f32 %v212_v47, %v171_v11  ;;  %v264_v10 = vstv %s837_s24 }
  0xbc   :  { %677 = vrot.lane.b32.xlu1 %v666_v38, %s895_s12  ;;  %675 = vrot.lane.b32.xlu0 %v665_v39, %s895_s12  ;;  %v266_v26 = vmul.f32 %v264_v10, %v937_v4  ;;  %v265_v33 = vmul.f32 %v264_v10, %v927_v1  ;;  %v714_v38 = vstv %s1237_s26  ;;  %v286_v39 = vmul.f32 %v956_v14, %v284_v21 }
  0xbd   :  { %v260_v5 = vadd.f32 %v256_v41, %v224_v49  ;;  %v259_v6 = vadd.f32 %v255_v42, %v223_v57  ;;  %v716_v43 = vmul.f32 %v1182_v34, %v714_v38  ;;  %v715_v1 = vmul.f32 %v1187_v36, %v714_v38 }
  0xbe   :  { %v218_v11 = vpop.permute.xlu1 %217  ;;  %v216_v12 = vpop.permute.xlu0 %215  ;;  %v268_v57 = vmul.f32 %v264_v10, %v932_v3  ;;  %v267_v14 = vmul.f32 %v264_v10, %v922_v0  ;;  %v718_v3 = vmul.f32 %v1202_v51, %v714_v38  ;;  %v717_v0 = vmul.f32 %v1207_v52, %v714_v38 }
  0xbf   :  { %v226_v15 = vadd.f32 %v218_v11, %v174_v22  ;;  %v225_v17 = vadd.f32 %v216_v12, %v173_v23  ;;  %v280_v24 = vadd.f32 %v276_v58, %v260_v5  ;;  %v279_v25 = vadd.f32 %v275_v61, %v259_v6 }
  0xc0   :  { %699 = vrot.lane.b32.xlu1 %v690_v59, %s895_s12  ;;  %697 = vrot.lane.b32.xlu0 %v689_v60, %s895_s12  ;;  %v287_v58 = vmul.f32 %v975_v20, %v284_v21 }
  0xc1   :  { %v262_v31 = vadd.f32 %v258_v63, %v226_v15  ;;  %v261_v32 = vadd.f32 %v257_v9, %v225_v17  ;;  %v740_v9 = vstv %s1257_s27 }
  0xc2   :  { %v240_v22 = vpop.permute.xlu1 %239  ;;  %v238_v23 = vpop.permute.xlu0 %237 }
  0xc3   :  { %v250_v41 = vadd.f32 %v240_v22, %v198_v27  ;;  %v249_v42 = vadd.f32 %v238_v23, %v197_v30  ;;  %v282_v4 = vadd.f32 %v278_v13, %v262_v31  ;;  %v281_v45 = vadd.f32 %v277_v18, %v261_v32 }
  0xc4   :  { %703 = vrot.lane.b32.xlu1 %v692_v28, %s895_s12  ;;  %701 = vrot.lane.b32.xlu0 %v691_v29, %s895_s12  ;;  %v288_v30 = vmul.f32 %v970_v19, %v284_v21  ;;  %v741_v13 = vmul.f32 %v1187_v36, %v740_v9 }
  0xc5   :  { %v270_v47 = vadd.f32 %v266_v26, %v250_v41  ;;  %v269_v49 = vadd.f32 %v265_v33, %v249_v42 }
  0xc6   :  { %v244_v16 = vpop.permute.xlu1 %243  ;;  %v242_v27 = vpop.permute.xlu0 %241 }
  0xc7   :  { %v252_v61 = vadd.f32 %v244_v16, %v1227_v35  ;;  %v251_v63 = vadd.f32 %v242_v27, %v1229_v37  ;;  %v290_v59 = vadd.f32 %v286_v39, %v270_v47  ;;  %v289_v60 = vadd.f32 %v285_v40, %v269_v49 }
  0xc8   :  { %725 = vrot.lane.b32.xlu1 %v716_v43, %s895_s12  ;;  %723 = vrot.lane.b32.xlu0 %v715_v1, %s895_s12  ;;  %v742_v37 = vmul.f32 %v1182_v34, %v740_v9 }
  0xc9   :  { %v272_v5 = vadd.f32 %v268_v57, %v252_v61  ;;  %v271_v6 = vadd.f32 %v267_v14, %v251_v63 }
  0xca   :  { %v310_v19 = vpop.permute.xlu1 %309  ;;  %v308_v10 = vpop.permute.xlu0 %307 }
  0xcb   :  { %v320_v20 = vadd.f32 %v310_v19, %v280_v24  ;;  %v319_v11 = vadd.f32 %v308_v10, %v279_v25  ;;  %v292_v35 = vadd.f32 %v288_v30, %v272_v5  ;;  %v291_v12 = vadd.f32 %v287_v58, %v271_v6 }
  0xcc   :  { %729 = vrot.lane.b32.xlu1 %v718_v3, %s895_s12  ;;  %727 = vrot.lane.b32.xlu0 %v717_v0, %s895_s12  ;;  %v744_v24 = vmul.f32 %v1202_v51, %v740_v9  ;;  %v743_v25 = vmul.f32 %v1207_v52, %v740_v9 }
  0xce   :  { %v314_v18 = vpop.permute.xlu1 %313  ;;  %v312_v21 = vpop.permute.xlu0 %311 }
  0xcf   :  { %v322_v15 = vadd.f32 %v314_v18, %v282_v4  ;;  %v321_v17 = vadd.f32 %v312_v21, %v281_v45 }
  0xd0   :  { %751 = vrot.lane.b32.xlu1 %v742_v37, %s895_s12  ;;  %749 = vrot.lane.b32.xlu0 %v741_v13, %s895_s12 }
  0xd2   :  { %v336_v26 = vpop.permute.xlu1 %335  ;;  %v334_v28 = vpop.permute.xlu0 %333 }
  0xd3   :  { %v346_v29 = vadd.f32 %v336_v26, %v290_v59  ;;  %v345_v31 = vadd.f32 %v334_v28, %v289_v60 }
  0xd4   :  { %755 = vrot.lane.b32.xlu1 %v744_v24, %s895_s12  ;;  %753 = vrot.lane.b32.xlu0 %v743_v25, %s895_s12  ;;  %s852_s12 = sld [smem:[#allocation2 + $0x5]] }
  0xd6   :  { %v340_v32 = vpop.permute.xlu1 %339  ;;  %v338_v33 = vpop.permute.xlu0 %337 }
  0xd7   :  { %v348_v38 = vadd.f32 %v340_v32, %v292_v35  ;;  %v347_v22 = vadd.f32 %v338_v33, %v291_v12 }
  0xda   :  { %v366_v23 = vpop.permute.xlu1 %365  ;;  %v364_v39 = vpop.permute.xlu0 %363 }
  0xdb   :  { %v376_v40 = vadd.f32 %v366_v23, %v320_v20  ;;  %v375_v41 = vadd.f32 %v364_v39, %v319_v11 }
  0xde   :  { %v370_v42 = vpop.permute.xlu1 %369  ;;  %v368_v4 = vpop.permute.xlu0 %367 }
  0xdf   :  { %v378_v45 = vadd.f32 %v370_v42, %v322_v15  ;;  %v377_v43 = vadd.f32 %v368_v4, %v321_v17 }
  0xe2   :  { %v392_v1 = vpop.permute.xlu1 %391  ;;  %v390_v47 = vpop.permute.xlu0 %389 }
  0xe3   :  { %v402_v49 = vadd.f32 %v392_v1, %v346_v29  ;;  %v401_v57 = vadd.f32 %v390_v47, %v345_v31  ;;  %v510_v1 = vstv %s852_s12 }
  0xe4   :  { %v512_v47 = vmul.f32 %v510_v1, %v1024_v48 }
  0xe6   :  { %v396_v14 = vpop.permute.xlu1 %395  ;;  %v394_v16 = vpop.permute.xlu0 %393 }
  0xe7   :  { %v404_v27 = vadd.f32 %v396_v14, %v348_v38  ;;  %v403_v30 = vadd.f32 %v394_v16, %v347_v22  ;;  %v511_v16 = vmul.f32 %v510_v1, %v1029_v50 }
  0xea   :  { %v418_v58 = vpop.permute.xlu1 %417  ;;  %v416_v61 = vpop.permute.xlu0 %415 }
  0xeb   :  { %v428_v63 = vadd.f32 %v418_v58, %v376_v40  ;;  %v427_v59 = vadd.f32 %v416_v61, %v375_v41  ;;  %v514_v58 = vmul.f32 %v510_v1, %v1038_v53  ;;  %v520_v61 = vstv %s853_s29 }
  0xee   :  { %v422_v60 = vpop.permute.xlu1 %421  ;;  %v420_v3 = vpop.permute.xlu0 %419 }
  0xef   :  { %v430_v0 = vadd.f32 %v422_v60, %v378_v45  ;;  %v429_v5 = vadd.f32 %v420_v3, %v377_v43  ;;  %v513_v60 = vmul.f32 %v510_v1, %v1043_v54 }
  0xf2   :  { %v444_v6 = vpop.permute.xlu1 %443  ;;  %v442_v9 = vpop.permute.xlu0 %441 }
  0xf3   :  { %v1286_v19 = vadd.f32 %v444_v6, %v402_v49  ;;  %v1288_v10 = vadd.f32 %v442_v9, %v401_v57  ;;  %v540_v9 = vstv %s855_s30 }
  0xf6   :  { %v448_v20 = vpop.permute.xlu1 %447  ;;  %v446_v11 = vpop.permute.xlu0 %445 }
  0xf7   :  { %v1290_v35 = vadd.f32 %v448_v20, %v404_v27  ;;  %v1292_v12 = vadd.f32 %v446_v11, %v403_v30  ;;  %v530_v30 = vstv %s854_s28 }
  0xf8   :  { %v532_v3 = vmul.f32 %v1060_v62, %v530_v30  ;;  %v531_v6 = vmul.f32 %v1065_v2, %v530_v30  ;;  %v533_v1 = vmul.f32 %v1079_v8, %v530_v30 }
  0xfa   :  { %v470_v37 = vpop.permute.xlu1 %469  ;;  %v468_v13 = vpop.permute.xlu0 %467 }
  0xfb   :  { %v480_v14 = vadd.f32 %v470_v37, %v428_v63  ;;  %v479_v27 = vadd.f32 %v468_v13, %v427_v59  ;;  %v522_v59 = vmul.f32 %v520_v61, %v1024_v48  ;;  %v521_v13 = vmul.f32 %v520_v61, %v1029_v50 }
  0xfd   :  { %v515_v63 = vadd.f32 %v511_v16, %v479_v27 }
  0xfe   :  { %v474_v18 = vpop.permute.xlu1 %473  ;;  %v472_v21 = vpop.permute.xlu0 %471 }
  0xff   :  { %v482_v37 = vadd.f32 %v474_v18, %v430_v0  ;;  %v786_v18 = vstv %s870_s5 }
 0x102   :  { %v496_v15 = vpop.permute.xlu1 %495  ;;  %v494_v17 = vpop.permute.xlu0 %493 }
 0x103   :  { %v505_v0 = vadd.f32 %v494_v17, %v1288_v10  ;;  %v788_v17 = vmul.f32 %v1182_v34, %v786_v18 }
 0x105   :  { %v525_v27 = vadd.f32 %v521_v13, %v505_v0 }
 0x106   :  { %v1294_v24 = vpop.permute.xlu1 %499  ;;  %v1296_v25 = vpop.permute.xlu0 %497 }
 0x10a   :  { %v1298_v26 = vpop.permute.xlu1 %565  ;;  %v1300_v28 = vpop.permute.xlu0 %563 }
 0x10e   :  { %v1302_v29 = vpop.permute.xlu1 %569  ;;  %v1304_v31 = vpop.permute.xlu0 %567 }
 0x112   :  { %v1306_v32 = vpop.permute.xlu1 %591  ;;  %v1308_v33 = vpop.permute.xlu0 %589 }
 0x116   :  { %v1310_v38 = vpop.permute.xlu1 %595  ;;  %v1312_v22 = vpop.permute.xlu0 %593 }
 0x117   :  { %1450 = vst [vmem:[#allocation5_spill] sm:$0xff] %v1310_v38  ;;  %1451 = vst [vmem:[#allocation6_spill] sm:$0xff] %v1312_v22  ;;  %v534_v22 = vmul.f32 %v1074_v7, %v530_v30  ;;  %v524_v38 = vmul.f32 %v520_v61, %v1038_v53  ;;  %v535_v53 = vadd.f32 %v531_v6, %v515_v63 }
 0x118   :  { %v790_v6 = vmul.f32 %v1202_v51, %v786_v18 }
 0x11a   :  { %v1314_v23 = vpop.permute.xlu1 %621  ;;  %v1316_v39 = vpop.permute.xlu0 %619 }
 0x11e   :  { %v1318_v40 = vpop.permute.xlu1 %625  ;;  %v1320_v41 = vpop.permute.xlu0 %623 }
 0x122   :  { %v1322_v42 = vpop.permute.xlu1 %647  ;;  %v1324_v4 = vpop.permute.xlu0 %645 }
 0x123   :  { %1452 = vst [vmem:[#allocation7_spill] sm:$0xff] %v1322_v42  ;;  %1453 = vst [vmem:[#allocation8_spill] sm:$0xff] %v1324_v4  ;;  %v542_v4 = vmul.f32 %v1060_v62, %v540_v9  ;;  %v541_v42 = vmul.f32 %v1065_v2, %v540_v9  ;;  %v544_v62 = vmul.f32 %v1074_v7, %v540_v9 }
 0x124   :  { %v543_v2 = vmul.f32 %v1079_v8, %v540_v9  ;;  %v508_v7 = vadd.f32 %v1294_v24, %v1290_v35  ;;  %v507_v8 = vadd.f32 %v1296_v25, %v1292_v12  ;;  %v789_v12 = vmul.f32 %v1207_v52, %v786_v18 }
 0x126   :  { %v1326_v45 = vpop.permute.xlu1 %651  ;;  %v1328_v43 = vpop.permute.xlu0 %649  ;;  %v528_v9 = vadd.f32 %v524_v38, %v508_v7  ;;  %v1460_v7 = vld [vmem:[#allocation5_spill] sm:$0xff] }
 0x127   :  { %1454 = vst [vmem:[#allocation9_spill] sm:$0xff] %v1326_v45  ;;  %1455 = vst [vmem:[#allocation10_spill] sm:$0xff] %v1328_v43  ;;  %v516_v43 = vadd.f32 %v512_v47, %v480_v14  ;;  %v481_v45 = vadd.f32 %v472_v21, %v429_v5  ;;  %v506_v47 = vadd.f32 %v496_v15, %v1286_v19 }
 0x128   :  { %v523_v5 = vmul.f32 %v520_v61, %v1043_v54  ;;  %v518_v21 = vadd.f32 %v514_v58, %v482_v37  ;;  %v575_v15 = vadd.f32 %v1300_v28, %v535_v53  ;;  %v545_v37 = vadd.f32 %v541_v42, %v525_v27 }
 0x129   :  { %v517_v14 = vadd.f32 %v513_v60, %v481_v45  ;;  %v536_v16 = vadd.f32 %v532_v3, %v516_v43  ;;  %v787_v45 = vmul.f32 %v1187_v36, %v786_v18  ;;  %v526_v43 = vadd.f32 %v522_v59, %v506_v47 }
 0x12a   :  { %v1331_v49 = vpop.permute.xlu1 %673  ;;  %v1333_v57 = vpop.permute.xlu0 %671  ;;  %v631_v60 = vadd.f32 %v1316_v39, %v575_v15  ;;  %v527_v39 = vadd.f32 %v523_v5, %v507_v8  ;;  %v776_v18 = vstv %s1358_s6  ;;  %v548_v5 = vadd.f32 %v544_v62, %v528_v9  ;;  %v1459_v53 = vld [vmem:[#allocation8_spill] sm:$0xff] }
 0x12b   :  { %v576_v54 = vadd.f32 %v1298_v26, %v536_v16  ;;  %v538_v26 = vadd.f32 %v534_v22, %v518_v21  ;;  %v537_v28 = vadd.f32 %v533_v1, %v517_v14  ;;  %v546_v63 = vadd.f32 %v542_v4, %v526_v43  ;;  %v1458_v16 = vld [vmem:[#allocation7_spill] sm:$0xff] }
 0x12c   :  { %v547_v14 = vadd.f32 %v543_v2, %v527_v39  ;;  %v604_v8 = vadd.f32 %v1460_v7, %v548_v5  ;;  %v780_v39 = vmul.f32 %v776_v18, %v1142_v55 }
 0x12d   :  { %v632_v61 = vadd.f32 %v1314_v23, %v576_v54  ;;  %v578_v24 = vadd.f32 %v1302_v29, %v538_v26  ;;  %v577_v25 = vadd.f32 %v1304_v31, %v537_v28  ;;  %v683_v23 = vadd.f32 %v1333_v57, %v631_v60  ;;  %v1461_v26 = vld [vmem:[#allocation6_spill] sm:$0xff] }
 0x12e   :  { %v1340_v20 = vpop.permute.xlu1 %677  ;;  %v1342_v11 = vpop.permute.xlu0 %675  ;;  %v602_v0 = vadd.f32 %v1306_v32, %v546_v63  ;;  %v601_v31 = vadd.f32 %v1308_v33, %v545_v37  ;;  %v603_v28 = vadd.f32 %v1461_v26, %v547_v14  ;;  %v779_v63 = vmul.f32 %v776_v18, %v1147_v56 }
 0x12f   :  { %1456 = vst [vmem:[#allocation11_spill] sm:$0xff] %v1340_v20  ;;  %v766_v20 = vstv %s868_s4  ;;  %v684_v22 = vadd.f32 %v1331_v49, %v632_v61  ;;  %v633_v1 = vadd.f32 %v1320_v41, %v577_v25  ;;  %v796_v49 = vstv %s1364_s7  ;;  %v1463_v61 = vld [vmem:[#allocation10_spill] sm:$0xff] }
 0x130   :  { %v768_v19 = vmul.f32 %v766_v20, %v1128_v44  ;;  %v767_v10 = vmul.f32 %v766_v20, %v1133_v46  ;;  %v770_v3 = vmul.f32 %v766_v20, %v1142_v55  ;;  %v769_v35 = vmul.f32 %v766_v20, %v1147_v56 }
 0x131   :  { %v634_v20 = vadd.f32 %v1318_v40, %v578_v24  ;;  %v685_v38 = vadd.f32 %v1342_v11, %v633_v1  ;;  %v658_v40 = vadd.f32 %v1458_v16, %v602_v0  ;;  %v657_v41 = vadd.f32 %v1459_v53, %v601_v31 }
 0x132   :  { %v1354_v48 = vpop.permute.xlu1 %699  ;;  %v1356_v50 = vpop.permute.xlu0 %697  ;;  %v778_v11 = vmul.f32 %v776_v18, %v1128_v44  ;;  %v800_v55 = vmul.f32 %v1202_v51, %v796_v49  ;;  %v799_v56 = vmul.f32 %v1207_v52, %v796_v49 }
 0x133   :  { %v710_v62 = vadd.f32 %v1354_v48, %v658_v40  ;;  %v709_v2 = vadd.f32 %v1356_v50, %v657_v41  ;;  %v798_v48 = vmul.f32 %v1182_v34, %v796_v49  ;;  %v797_v50 = vmul.f32 %v1187_v36, %v796_v49 }
 0x136   :  { %v1374_v30 = vpop.permute.xlu1 %703  ;;  %v1376_v58 = vpop.permute.xlu0 %701  ;;  %v1457_v21 = vld [vmem:[#allocation11_spill] sm:$0xff] }
 0x137   :  { %v686_v57 = vadd.f32 %v1457_v21, %v634_v20 }
 0x13a   :  { %v726_v59 = vpop.permute.xlu1 %725  ;;  %v724_v13 = vpop.permute.xlu0 %723 }
 0x13b   :  { %v736_v47 = vadd.f32 %v726_v59, %v684_v22  ;;  %v735_v29 = vadd.f32 %v724_v13, %v683_v23 }
 0x13d   :  { %v772_v4 = vadd.f32 %v768_v19, %v736_v47  ;;  %v771_v42 = vadd.f32 %v767_v10, %v735_v29  ;;  %v777_v19 = vmul.f32 %v776_v18, %v1133_v46  ;;  %v659_v46 = vadd.f32 %v1463_v61, %v603_v28 }
 0x13e   :  { %v730_v54 = vpop.permute.xlu1 %729  ;;  %v728_v15 = vpop.permute.xlu0 %727 }
 0x13f   :  { %v792_v43 = vadd.f32 %v788_v17, %v772_v4  ;;  %v791_v32 = vadd.f32 %v787_v45, %v771_v42  ;;  %v738_v27 = vadd.f32 %v730_v54, %v686_v57  ;;  %v737_v33 = vadd.f32 %v728_v15, %v685_v38  ;;  %v1462_v45 = vld [vmem:[#allocation9_spill] sm:$0xff] }
 0x140   :  { %v660_v44 = vadd.f32 %v1462_v45, %v604_v8 }
 0x141   :  { %808 = vst.msk [vmem:[%s1449_s3 + $0x8] sm:$0x3] %vm807_vm0, %v792_v43  ;;  %v774_v10 = vadd.f32 %v770_v3, %v738_v27  ;;  %v773_v17 = vadd.f32 %v769_v35, %v737_v33  ;;  %v711_v35 = vadd.f32 %v1376_v58, %v659_v46 }
 0x142   :  { %806 = vst.msk [vmem:[%s1449_s3] sm:$0xff] %vm805_vm1, %v791_v32  ;;  %v752_v60 = vpop.permute.xlu1 %751  ;;  %v750_v24 = vpop.permute.xlu0 %749  ;;  %v712_v3 = vadd.f32 %v1374_v30, %v660_v44 }
 0x143   :  { %v794_v25 = vadd.f32 %v790_v6, %v774_v10  ;;  %v793_v22 = vadd.f32 %v789_v12, %v773_v17  ;;  %v762_v23 = vadd.f32 %v752_v60, %v710_v62  ;;  %v761_v9 = vadd.f32 %v750_v24, %v709_v2 }
 0x145   :  { %810 = vst.msk [vmem:[%s1449_s3 + $0x18] sm:$0x3] %vm807_vm0, %v794_v25  ;;  %v782_v34 = vadd.f32 %v778_v11, %v762_v23  ;;  %v781_v36 = vadd.f32 %v777_v19, %v761_v9 }
 0x146   :  { %809 = vst.msk [vmem:[%s1449_s3 + $0x10] sm:$0xff] %vm805_vm1, %v793_v22  ;;  %v756_v6 = vpop.permute.xlu1 %755  ;;  %v754_v30 = vpop.permute.xlu0 %753 }
 0x147   :  { %v802_v12 = vadd.f32 %v798_v48, %v782_v34  ;;  %v801_v58 = vadd.f32 %v797_v50, %v781_v36  ;;  %v764_v37 = vadd.f32 %v756_v6, %v712_v3  ;;  %v763_v59 = vadd.f32 %v754_v30, %v711_v35 }
 0x149   :  { %873 = vst.msk [vmem:[%s1449_s3 + $0x28] sm:$0x3] %vm807_vm0, %v802_v12  ;;  %v784_v13 = vadd.f32 %v780_v39, %v764_v37  ;;  %v783_v51 = vadd.f32 %v779_v63, %v763_v59 }
 0x14a   :  { %872 = vst.msk [vmem:[%s1449_s3 + $0x20] sm:$0xff] %vm805_vm1, %v801_v58 }
 0x14b   :  { %v804_v20 = vadd.f32 %v800_v55, %v784_v13  ;;  %v803_v1 = vadd.f32 %v799_v56, %v783_v51 }
 0x14d   :  { %875 = vst.msk [vmem:[%s1449_s3 + $0x38] sm:$0x3] %vm807_vm0, %v804_v20 }
 0x14e   :  { %874 = vst.msk [vmem:[%s1449_s3 + $0x30] sm:$0xff] %vm805_vm1, %v803_v1 }
 0x14f   :  { %820 = vsyncpa [#allocation3], 1 }

</bundles_post_ra>
